<compile_context>
chip_gen: v7x
topology: tpu7x:2x2x1
jax: 0.10.0
libtpu: 0.0.40
codegen_flags: <defaults>
</compile_context>

<pallas_src>
import functools

import jax
import jax.numpy as jnp
from jax.experimental import pallas as pl
from jax.experimental.pallas import tpu as pltpu


def _disc_kernel(x_ref, w1_ref, b1_ref, w2_ref, b2_ref, w3_ref, b3_ref, o_ref):
    """One batch tile per grid step; all weights fully resident in VMEM."""
    cdt = w1_ref.dtype                            # matmul streaming dtype (bf16 or f32)
    x = x_ref[...].astype(cdt)                    # (tb, S+A)

    # Layer 1 (fused state+action matmul): f32 accumulation on the MXU.
    h1 = jnp.dot(x, w1_ref[...], preferred_element_type=jnp.float32)
    h1 = jnp.maximum(h1 + b1_ref[...], 0.0)       # (tb, H) f32

    # Layer 2.
    h2 = jnp.dot(h1.astype(cdt), w2_ref[...], preferred_element_type=jnp.float32)
    h2 = jnp.maximum(h2 + b2_ref[...], 0.0)       # (tb, H) f32

    # Layer 3 (out_features == 1): VPU multiply + cross-lane reduce (XLU slot)
    # instead of an N=1 MXU matmul; written lane-dense as a (1, tb) row.
    logits = jnp.sum(h2 * w3_ref[...], axis=-1)[None, :] + b3_ref[0]   # (1, tb) f32
    o_ref[...] = jax.nn.sigmoid(logits)


def _pick_batch_tile(B, H):
    """256-512 row tiles amortize the ~0.35us/step grid overhead; keep >=2 grid
    steps for pipelining / megacore, and cap the tile on small-VMEM parts."""
    try:
        vmem = int(pltpu.get_tpu_info().vmem_capacity_bytes)
    except Exception:  # no TPU info available (e.g. interpret mode)
        vmem = 64 << 20
    cap = 256 if (H >= 1024 or vmem <= (64 << 20)) else 512
    for tb in (512, 256, 128):
        if tb <= cap and B >= 2 * tb:
            return tb
    return 128


def _vmem_limit_bytes(tb, K, H, mm_bytes):
    """Explicit scoped-VMEM budget: double-buffered weights + I/O tiles plus the
    f32 (tb,H) intermediates, with headroom (v5e default is only 16 MiB)."""
    weights = (K * H + H * H) * mm_bytes + 3 * H * 4      # W1, W2 + b1, b2, w3(f32)
    io = tb * K * 4 + tb * 4                              # x tile + (1, tb) out row
    inter = 2 * tb * H * 4                                # h1, h2 f32
    need = 2 * (weights + io) + inter                     # default double-buffering
    return int(min(max(need * 3 // 2 + (4 << 20), 32 << 20), 100 << 20))


@functools.partial(jax.jit, static_argnames=("batch_tile",))
def discriminator_forward(state, action, params, *, batch_tile=None):
    """Pallas TPU forward pass for the GAIL Discriminator MLP.

    params = (w1, b1, w2, b2, w3, b3) with weights stored (in_features,
    out_features); w1/w2 may be bf16 (default), biases and w3 are f32.
    """
    w1, b1, w2, b2, w3, b3 = params
    B, S = state.shape
    A = action.shape[1]
    K, H = w1.shape
    assert K == S + A and w2.shape == (H, H), "bad weight shapes"

    tb = _pick_batch_tile(B, H) if batch_tile is None else batch_tile
    assert tb % 128 == 0, "batch_tile must be a multiple of 128 (lane-dense output)"
    B_pad = ((B + tb - 1) // tb) * tb
    grid = (B_pad // tb,)

    x = jnp.concatenate([state, action], axis=1)          # tiny (B, S+A) concat
    if B_pad != B:   # ragged batch: zero-pad rows, slice off after the kernel
        x = jnp.pad(x, ((0, B_pad - B), (0, 0)))

    # Epilogue params stay f32; b3 is a single scalar -> SMEM (no padded VMEM tile).
    b1_r = b1.reshape(1, H).astype(jnp.float32)
    b2_r = b2.reshape(1, H).astype(jnp.float32)
    w3_r = w3.reshape(1, H).astype(jnp.float32)
    b3_r = b3.reshape(1).astype(jnp.float32)

    def invariant(shape):
        # Grid-invariant weight/bias block (same block every step).
        # TODO(synk): at H >= 1024 on v7x, single-buffer these specs via
        # pipeline_mode=pl.Buffered(1) to halve resident weight VMEM.
        return pl.BlockSpec(shape, lambda i: (0, 0))

    mm_bytes = w1.dtype.itemsize
    cost = pl.CostEstimate(
        flops=2 * B_pad * (K * H + H * H + H),
        transcendentals=B_pad,                             # sigmoid exp per output
        bytes_accessed=(B_pad * K * 4 + (K * H + H * H) * mm_bytes
                        + 3 * H * 4 + 4 + B_pad * 4),
    )

    out_row = pl.pallas_call(
        _disc_kernel,
        out_shape=jax.ShapeDtypeStruct((1, B_pad), jnp.float32),
        grid_spec=pltpu.PrefetchScalarGridSpec(
            num_scalar_prefetch=0,
            grid=grid,
            in_specs=[
                pl.BlockSpec((tb, K), lambda i: (i, 0)),              # x tile
                invariant((K, H)),                                    # W1 (fused)
                invariant((1, H)),                                    # b1
                invariant((H, H)),                                    # W2
                invariant((1, H)),                                    # b2
                invariant((1, H)),                                    # W3 row (f32)
                pl.BlockSpec(memory_space=pltpu.MemorySpace.SMEM),    # b3 scalar
            ],
            out_specs=pl.BlockSpec((1, tb), lambda i: (0, i)),        # lane-dense row
        ),
        compiler_params=pltpu.CompilerParams(
            dimension_semantics=("parallel",),
            vmem_limit_bytes=_vmem_limit_bytes(tb, K, H, mm_bytes),
        ),
        cost_estimate=cost,
    )(x, w1, b1_r, w2, b2_r, w3_r, b3_r)

    return out_row[0, :B].reshape(B, 1)


def init_params(key, state_dim, action_dim, hidden_dim=256,
                matmul_dtype=jnp.bfloat16):
    """nn.Linear-style init (uniform +-1/sqrt(fan_in)); weights stored (in, out).

    W1/W2 are cast to `matmul_dtype` (bf16 by default: native MXU dtype on
    v6e/v7x, halves streamed weight bytes, f32 accumulation). Biases and the
    tiny final-layer weight stay f32 for the f32 VPU/EUP epilogue. Note the
    kernel also streams the activations in `matmul_dtype`.
    """
    def linear(k, fan_in, fan_out):
        kw, kb = jax.random.split(k)
        bound = 1.0 / jnp.sqrt(fan_in)
        w = jax.random.uniform(kw, (fan_in, fan_out), jnp.float32, -bound, bound)
        b = jax.random.uniform(kb, (fan_out,), jnp.float32, -bound, bound)
        return w, b

    k1, k2, k3 = jax.random.split(key, 3)
    w1, b1 = linear(k1, state_dim + action_dim, hidden_dim)
    w2, b2 = linear(k2, hidden_dim, hidden_dim)
    w3, b3 = linear(k3, hidden_dim, 1)
    return (w1.astype(matmul_dtype), b1, w2.astype(matmul_dtype), b2, w3, b3)


def _reference_forward(state, action, params):
    w1, b1, w2, b2, w3, b3 = [jnp.asarray(p, jnp.float32) for p in params]
    x = jnp.concatenate([state, action], axis=1).astype(jnp.float32)
    h1 = jax.nn.relu(x @ w1 + b1)
    h2 = jax.nn.relu(h1 @ w2 + b2)
    return jax.nn.sigmoid(h2 @ w3 + b3)


if __name__ == "__main__":
    key = jax.random.PRNGKey(0)
    k_s, k_a, k_p = jax.random.split(key, 3)

    batch, state_dim, action_dim, hidden_dim = 300, 16, 8, 128

    state = jax.random.normal(k_s, (batch, state_dim), jnp.float32)
    action = jax.random.normal(k_a, (batch, action_dim), jnp.float32)

    # f32-weight path vs pure-JAX reference. Tolerance is deliberately loose:
    # both the Mosaic matmul and the XLA reference may run f32 via bf16 MXU
    # passes at default precision, so bit-tight agreement is not guaranteed.
    params_f32 = init_params(k_p, state_dim, action_dim, hidden_dim, jnp.float32)
    ref = _reference_forward(state, action, params_f32)
    out_f32 = jax.block_until_ready(discriminator_forward(state, action, params_f32))
    assert out_f32.shape == (batch, 1), out_f32.shape
    assert float(jnp.max(jnp.abs(out_f32 - ref))) < 2e-2, "f32 mismatch vs reference"

    # Default (bf16-weight/activation) path: halved streamed bytes, ~3x fewer
    # MXU pushes on layer 2, f32 accumulation. Post-sigmoid drift bound.
    params_bf16 = init_params(k_p, state_dim, action_dim, hidden_dim)
    out_bf16 = jax.block_until_ready(
        discriminator_forward(state, action, params_bf16))
    assert out_bf16.shape == (batch, 1), out_bf16.shape
    assert float(jnp.max(jnp.abs(out_bf16 - ref))) < 5e-2, "bf16 drift vs reference"

    print("KERNEL_OK")
</pallas_src>

<mosaic_0001>
module attributes {stable_mosaic.version = 11 : i64} {
  func.func @_disc_kernel(%arg0: i32, %arg1: memref<128x24xf32, #tpu.memory_space<vmem>>, %arg2: memref<24x128xf32, #tpu.memory_space<vmem>>, %arg3: memref<1x128xf32, #tpu.memory_space<vmem>>, %arg4: memref<128x128xf32, #tpu.memory_space<vmem>>, %arg5: memref<1x128xf32, #tpu.memory_space<vmem>>, %arg6: memref<1x128xf32, #tpu.memory_space<vmem>>, %arg7: memref<1xf32, #tpu.memory_space<smem>>, %arg8: memref<1x128xf32, #tpu.memory_space<vmem>>) attributes {dimension_semantics = [#tpu.dimension_semantics<parallel>], iteration_bounds = array<i64: 3>, scalar_prefetch = 0 : i64, scratch_operands = 0 : i64, tpu.core_type = #tpu.core_type<tc>, window_params = [{transform_indices = @transform_0, window_bounds = array<i64: 128, 24>}, {pipeline_mode = #tpu.pipeline_mode<synchronous>, transform_indices = @transform_1, window_bounds = array<i64: 24, 128>}, {pipeline_mode = #tpu.pipeline_mode<synchronous>, transform_indices = @transform_2, window_bounds = array<i64: 1, 128>}, {pipeline_mode = #tpu.pipeline_mode<synchronous>, transform_indices = @transform_3, window_bounds = array<i64: 128, 128>}, {pipeline_mode = #tpu.pipeline_mode<synchronous>, transform_indices = @transform_4, window_bounds = array<i64: 1, 128>}, {pipeline_mode = #tpu.pipeline_mode<synchronous>, transform_indices = @transform_5, window_bounds = array<i64: 1, 128>}, {transform_indices = @transform_6, window_bounds = array<i64: 1>}, {transform_indices = @transform_7, window_bounds = array<i64: 1, 128>}]} {
    %c0 = arith.constant 0 : index
    %c0_0 = arith.constant 0 : index
    %0 = vector.load %arg1[%c0, %c0_0] : memref<128x24xf32, #tpu.memory_space<vmem>>, vector<128x24xf32>
    %c0_1 = arith.constant 0 : index
    %c0_2 = arith.constant 0 : index
    %1 = vector.load %arg2[%c0_1, %c0_2] : memref<24x128xf32, #tpu.memory_space<vmem>>, vector<24x128xf32>
    %cst = arith.constant dense<0.000000e+00> : vector<128x128xf32>
    %2 = tpu.matmul %0, %1, %cst {dimension_numbers = #tpu.dot_dimension_numbers<[1], [0], [0], [1], [0, 0, 1, 1], [], []>} : vector<128x24xf32>, vector<24x128xf32>, vector<128x128xf32> -> vector<128x128xf32>
    %c0_3 = arith.constant 0 : index
    %c0_4 = arith.constant 0 : index
    %3 = vector.load %arg3[%c0_3, %c0_4] : memref<1x128xf32, #tpu.memory_space<vmem>>, vector<1x128xf32>
    %4 = vector.broadcast %3 : vector<1x128xf32> to vector<128x128xf32>
    %5 = arith.addf %2, %4 : vector<128x128xf32>
    %cst_5 = arith.constant 0.000000e+00 : f32
    %6 = vector.broadcast %cst_5 : f32 to vector<128x128xf32>
    %7 = arith.maximumf %5, %6 : vector<128x128xf32>
    %c0_6 = arith.constant 0 : index
    %c0_7 = arith.constant 0 : index
    %8 = vector.load %arg4[%c0_6, %c0_7] : memref<128x128xf32, #tpu.memory_space<vmem>>, vector<128x128xf32>
    %cst_8 = arith.constant dense<0.000000e+00> : vector<128x128xf32>
    %9 = tpu.matmul %7, %8, %cst_8 {dimension_numbers = #tpu.dot_dimension_numbers<[1], [0], [0], [1], [0, 0, 1, 1], [], []>} : vector<128x128xf32>, vector<128x128xf32>, vector<128x128xf32> -> vector<128x128xf32>
    %c0_9 = arith.constant 0 : index
    %c0_10 = arith.constant 0 : index
    %10 = vector.load %arg5[%c0_9, %c0_10] : memref<1x128xf32, #tpu.memory_space<vmem>>, vector<1x128xf32>
    %11 = vector.broadcast %10 : vector<1x128xf32> to vector<128x128xf32>
    %12 = arith.addf %9, %11 : vector<128x128xf32>
    %cst_11 = arith.constant 0.000000e+00 : f32
    %13 = vector.broadcast %cst_11 : f32 to vector<128x128xf32>
    %14 = arith.maximumf %12, %13 : vector<128x128xf32>
    %c0_12 = arith.constant 0 : index
    %c0_13 = arith.constant 0 : index
    %15 = vector.load %arg6[%c0_12, %c0_13] : memref<1x128xf32, #tpu.memory_space<vmem>>, vector<1x128xf32>
    %16 = vector.broadcast %15 : vector<1x128xf32> to vector<128x128xf32>
    %17 = arith.mulf %14, %16 : vector<128x128xf32>
    %cst_14 = arith.constant dense<0.000000e+00> : vector<128xf32>
    %18 = vector.multi_reduction <add>, %17, %cst_14 [1] : vector<128x128xf32> to vector<128xf32>
    %19 = vector.shape_cast %18 : vector<128xf32> to vector<1x128xf32>
    %c0_15 = arith.constant 0 : index
    %20 = memref.load %arg7[%c0_15] : memref<1xf32, #tpu.memory_space<smem>>
    %21 = vector.broadcast %20 : f32 to vector<1x128xf32>
    %22 = arith.addf %19, %21 : vector<1x128xf32>
    %23 = arith.negf %22 : vector<1x128xf32>
    %24 = math.exp %23 : vector<1x128xf32>
    %cst_16 = arith.constant 1.000000e+00 : f32
    %25 = vector.broadcast %cst_16 : f32 to vector<1x128xf32>
    %26 = arith.addf %25, %24 : vector<1x128xf32>
    %27 = arith.divf %25, %26 : vector<1x128xf32>
    %c0_17 = arith.constant 0 : index
    %c0_18 = arith.constant 0 : index
    %28 = vector.load %arg8[%c0_17, %c0_18] : memref<1x128xf32, #tpu.memory_space<vmem>>, vector<1x128xf32>
    tpu.vector_store %arg8[%c0_17, %c0_18], %27 {strides = array<i32>} : memref<1x128xf32, #tpu.memory_space<vmem>>, vector<1x128xf32>,
    return
  }
  func.func @transform_0(%arg0: i32) -> (i32, i32) {
    %c0_i32 = arith.constant 0 : i32
    %c0_i32_0 = arith.constant 0 : i32
    return %arg0, %c0_i32 : i32, i32
  }
  func.func @transform_1(%arg0: i32) -> (i32, i32) {
    %c0_i32 = arith.constant 0 : i32
    %c0_i32_0 = arith.constant 0 : i32
    %c0_i32_1 = arith.constant 0 : i32
    return %c0_i32, %c0_i32_0 : i32, i32
  }
  func.func @transform_2(%arg0: i32) -> (i32, i32) {
    %c0_i32 = arith.constant 0 : i32
    %c0_i32_0 = arith.constant 0 : i32
    %c0_i32_1 = arith.constant 0 : i32
    return %c0_i32, %c0_i32_0 : i32, i32
  }
  func.func @transform_3(%arg0: i32) -> (i32, i32) {
    %c0_i32 = arith.constant 0 : i32
    %c0_i32_0 = arith.constant 0 : i32
    %c0_i32_1 = arith.constant 0 : i32
    return %c0_i32, %c0_i32_0 : i32, i32
  }
  func.func @transform_4(%arg0: i32) -> (i32, i32) {
    %c0_i32 = arith.constant 0 : i32
    %c0_i32_0 = arith.constant 0 : i32
    %c0_i32_1 = arith.constant 0 : i32
    return %c0_i32, %c0_i32_0 : i32, i32
  }
  func.func @transform_5(%arg0: i32) -> (i32, i32) {
    %c0_i32 = arith.constant 0 : i32
    %c0_i32_0 = arith.constant 0 : i32
    %c0_i32_1 = arith.constant 0 : i32
    return %c0_i32, %c0_i32_0 : i32, i32
  }
  func.func @transform_6(%arg0: i32) -> i32 {
    %c0_i32 = arith.constant 0 : i32
    %c0_i32_0 = arith.constant 0 : i32
    return %c0_i32 : i32
  }
  func.func @transform_7(%arg0: i32) -> (i32, i32) {
    %c0_i32 = arith.constant 0 : i32
    %c0_i32_0 = arith.constant 0 : i32
    return %c0_i32, %arg0 : i32, i32
  }
}

</mosaic_0001>

<bundles_post_ra>
// kernel: discriminator_forward.1
= control target key start
LH: loop header
LB: loop body
LE: loop exit
PB: predicated region body
PF: predicated region fallthrough
CT: control target
= control target key end

     0   :  { %s1399_s26 = smov 0   ;;  %s1617_s0 = inlined_call_operand.vmem [shape: f32[384,24], index: 0, kind: input, shape index: {}]   ;;  %s1618_s1 = inlined_call_operand.vmem [shape: f32[24,128], index: 1, kind: input, shape index: {}]   ;;  %s1619_s2 = inlined_call_operand.vmem [shape: f32[1,128], index: 2, kind: input, shape index: {}]   ;;  %s1620_s3 = inlined_call_operand.vmem [shape: f32[128,128], index: 3, kind: input, shape index: {}]   ;;  %s1621_s4 = inlined_call_operand.vmem [shape: f32[1,128], index: 4, kind: input, shape index: {}]   ;;  %s1622_s5 = inlined_call_operand.vmem [shape: f32[1,128], index: 5, kind: input, shape index: {}]   ;;  %s1623_s6 = inlined_call_operand.<no memory space> [shape: f32[1], index: 6, kind: input, shape index: {}]   ;;  %s1624_s7 = inlined_call_operand.vmem [shape: f32[1,384], index: 7, kind: output, shape index: {}]  }
   0x1   :  { %12 = sst [smem:[#allocation2]] %s1623_s6 }
   0x2 LB: > { %s1405_s27 = sadd.s32 4294967295, %s1354_s26   ;;  %p1047_p0 = scmp.ge.s32.totalorder %s1354_s26, 1  ;;  %s1354_s26 = sphi %s1399_s26, %s18_s26  }
   0x3   : > { %p239_p1 = scmp.lt.s32.totalorder %s1354_s26, 4 }
   0x5   : > { %p240_p2 = pnand %p1047_p0, %p239_p1 }
   0x6   : > { %v294_v0 = vld [vmem:[%s1618_s1] sm:$0xff] (!%p240_p2)  ;;  %v295_v1 = vld [vmem:[%s1618_s1 + $0x8] sm:$0xff] (!%p240_p2)  ;;  %s1048_s8 = sshll.u32 (!%p240_p2), %s1405_s27, 4  ;;  %v516_v5 = vld [vmem:[%s1620_s3 + $0x10] sm:$0xff] (!%p240_p2)  ;;  %vm304_vm0 = vcmask (!%p240_p2), 195584   ;;  %s753_s9 = sld [smem:[#allocation2]] (!%p240_p2) }
   0x7   : > { %243 = sbr.rel (%p240_p2) target bundleno = 663 (0x297), region = 48  ;;  %v1224_v2 = vpack.c.bf16 (!%p240_p2), %v295_v1, %v294_v0  ;;  %p270_p3 = scmp.lt.s32.totalorder (!%p240_p2), %s1048_s8, 47  ;;  %v514_v3 = vld [vmem:[%s1620_s3] sm:$0xff] (!%p240_p2)  ;;  %v515_v4 = vld [vmem:[%s1620_s3 + $0x8] sm:$0xff] (!%p240_p2)  ;;  %v296_v6 = vld [vmem:[%s1618_s1 + $0x10] sm:$0xff] (!%p240_p2)  ;;  %vm894_vm1 = vcmask (!%p240_p2), 130112  }
   0x8   : > { %v1228_v7 = vpack.c.bf16 (!%p240_p2), %v515_v4, %v514_v3  ;;  %v517_v8 = vld [vmem:[%s1620_s3 + $0x18] sm:$0xff] (!%p240_p2)  ;;  %v518_v10 = vld [vmem:[%s1620_s3 + $0x20] sm:$0xff] (!%p240_p2)  ;;  %v519_v11 = vld [vmem:[%s1620_s3 + $0x28] sm:$0xff] (!%p240_p2)  ;;  %vm901_vm2 = vcmask (!%p240_p2), 195712   ;;  %vm908_vm3 = vcmask (!%p240_p2), 261312   ;;  %vm915_vm4 = vcmask (!%p240_p2), 326912  }
   0x9   : > { %1225 = vmatprep.subr.bf16.mxu0 (!%p240_p2), %v1224_v2  ;;  %v1232_v9 = vpack.c.bf16 (!%p240_p2), %v517_v8, %v516_v5  ;;  %v1236_v16 = vpack.c.bf16 (!%p240_p2), %v519_v11, %v518_v10  ;;  %v520_v18 = vld [vmem:[%s1620_s3 + $0x30] sm:$0xff] (!%p240_p2)  ;;  %v521_v19 = vld [vmem:[%s1620_s3 + $0x38] sm:$0xff] (!%p240_p2)  ;;  %v522_v23 = vld [vmem:[%s1620_s3 + $0x40] sm:$0xff] (!%p240_p2)  ;;  %vm922_vm5 = vcmask (!%p240_p2), 392512   ;;  %vm929_vm6 = vcmask (!%p240_p2), 458112   ;;  %p275_p4 = scmp.lt.s32.totalorder (!%p240_p2), %s1405_s27, 2 }
   0xa   : > { %1227 = vmatpush3.bf16.msra.mxu0 (!%p240_p2), %v1224_v2  ;;  %1260 = vmatprep.subr.bf16.mxu1 (!%p240_p2), %v1228_v7  ;;  %v1240_v21 = vpack.c.bf16 (!%p240_p2), %v521_v19, %v520_v18  ;;  %v523_v24 = vld [vmem:[%s1620_s3 + $0x48] sm:$0xff] (!%p240_p2)  ;;  %v524_v28 = vld [vmem:[%s1620_s3 + $0x50] sm:$0xff] (!%p240_p2)  ;;  %v525_v29 = vld [vmem:[%s1620_s3 + $0x58] sm:$0xff] (!%p240_p2)  ;;  %vm936_vm7 = vcmask (!%p240_p2), 523712   ;;  %vm943_vm8 = vcmask (!%p240_p2), 589312   ;;  %vm950_vm9 = vcmask (!%p240_p2), 654912  }
   0xb   : > { %1142 = vmatprep.subr.mxu0 (!%p240_p2), %v296_v6  ;;  %1268 = vmatpush3.bf16.msra.mxu1 (!%p240_p2), %v1228_v7  ;;  %v1244_v26 = vpack.c.bf16 (!%p240_p2), %v523_v24, %v522_v23  ;;  %v1248_v31 = vpack.c.bf16 (!%p240_p2), %v525_v29, %v524_v28  ;;  %v526_v33 = vld [vmem:[%s1620_s3 + $0x60] sm:$0xff] (!%p240_p2)  ;;  %v527_v34 = vld [vmem:[%s1620_s3 + $0x68] sm:$0xff] (!%p240_p2)  ;;  %v528_v41 = vld [vmem:[%s1620_s3 + $0x70] sm:$0xff] (!%p240_p2)  ;;  %vm957_vm10 = vcmask (!%p240_p2), 720512   ;;  %vm964_vm11 = vcmask (!%p240_p2), 786112  }
   0xc   : > { %1261 = vmatprep.subr.bf16.mxu1 (!%p240_p2), %v1232_v9  ;;  %v1252_v36 = vpack.c.bf16 (!%p240_p2), %v527_v34, %v526_v33  ;;  %v529_v42 = vld [vmem:[%s1620_s3 + $0x78] sm:$0xff] (!%p240_p2)  ;;  %v1050_v44 = vld [vmem:[%s1619_s2] ss:$0 sm:$0xff] (!%p240_p2)  ;;  %vm971_vm12 = vcmask (!%p240_p2), 851712   ;;  %vm978_vm13 = vcmask (!%p240_p2), 917312   ;;  %vm985_vm14 = vcmask (!%p240_p2), 982912  }
   0xd   : > { %v1256_v43 = vpack.c.bf16 (!%p240_p2), %v529_v42, %v528_v41  ;;  %v1510_v29 = vld [vmem:[%s1621_s4] ss:$0 sm:$0xff] (!%p240_p2)  ;;  %vm992_vm15 = vcmask (!%p240_p2), 1048512  }
   0xe   : > { %s1626_s8 = smov (!%p270_p3, %s1048_s8), 47  ;;  %1143 = vmatpush3.msra.mxu0 %v296_v6  ;;  %v1517_v34 = vld [vmem:[%s1622_s5] ss:$0 sm:$0xff]  ;;  %s1628_s27 = smov (!%p275_p4, %s1405_s27), 2 }
   0xf   : > { %s1049_s19 = sshll.u32 %s1626_s8, 3  ;;  %1229 = vmatprep.subr.bf16.mxu0 %v1228_v7  ;;  %1269 = vmatpush3.bf16.msra.mxu1 %v1232_v9  ;;  %s277_s12 = scalar_lea.vmem %s1624_s7, %s1628_s27 }
  0x10   : > { %s1434_s22 = scalar_lea.vmem %s1617_s0, %s1049_s19  ;;  %1262 = vmatprep.subr.bf16.mxu1 %v1236_v16 }
  0x11   : > { %v278_v12 = vld [vmem:[%s1434_s22] sm:$0xff]  ;;  %v279_v13 = vld [vmem:[%s1434_s22 + $0x8] sm:$0xff]  ;;  %v280_v14 = vld [vmem:[%s1434_s22 + $0x10] sm:$0xff] }
  0x12   : > { %1144 = vmatprep.mubr.msk.f32.mxu0 %vm304_vm0, %v278_v12  ;;  %v281_v15 = vld [vmem:[%s1434_s22 + $0x18] sm:$0xff]  ;;  %v282_v17 = vld [vmem:[%s1434_s22 + $0x20] sm:$0xff]  ;;  %v283_v20 = vld [vmem:[%s1434_s22 + $0x28] sm:$0xff] }
  0x13   : > { %1145 = vmatmul.mubr.msk.f32.vlgmr.msra.gmra.mrb[0].mxu0 %vm304_vm0, %v279_v13  ;;  %v284_v22 = vld [vmem:[%s1434_s22 + $0x30] sm:$0xff]  ;;  %1270 = vmatpush3.bf16.msra.mxu1 %v1236_v16  ;;  %v285_v25 = vld [vmem:[%s1434_s22 + $0x38] sm:$0xff]  ;;  %v286_v27 = vld [vmem:[%s1434_s22 + $0x40] sm:$0xff] }
  0x14   : > { %1147 = vmatprep.mubr.msk.f32.mxu0 %vm304_vm0, %v280_v14  ;;  %1231 = vmatpush3.bf16.msra.mxu0 %v1228_v7  ;;  %v287_v30 = vld [vmem:[%s1434_s22 + $0x48] sm:$0xff]  ;;  %v288_v32 = vld [vmem:[%s1434_s22 + $0x50] sm:$0xff]  ;;  %v289_v35 = vld [vmem:[%s1434_s22 + $0x58] sm:$0xff] }
  0x15   : > { %1233 = vmatprep.subr.bf16.mxu0 %v1232_v9  ;;  %1263 = vmatprep.subr.bf16.mxu1 %v1240_v21  ;;  %v290_v37 = vld [vmem:[%s1434_s22 + $0x60] sm:$0xff]  ;;  %v291_v38 = vld [vmem:[%s1434_s22 + $0x68] sm:$0xff]  ;;  %v292_v39 = vld [vmem:[%s1434_s22 + $0x70] sm:$0xff] }
  0x16   : > { %v293_v40 = vld [vmem:[%s1434_s22 + $0x78] sm:$0xff] }
  0x17   : > { %1148 = vmatmul.mubr.msk.f32.gmra.mrb[2].mxu0 %vm304_vm0, %v281_v15  ;;  %1271 = vmatpush3.bf16.msra.mxu1 %v1240_v21 }
  0x18   : > { %1150 = vmatprep.mubr.msk.f32.mxu0 %vm304_vm0, %v282_v17  ;;  %1235 = vmatpush3.bf16.msra.mxu0 %v1232_v9 }
  0x19   : > { %1237 = vmatprep.subr.bf16.mxu0 %v1236_v16  ;;  %1264 = vmatprep.subr.bf16.mxu1 %v1244_v26 }
  0x1b   : > { %1151 = vmatmul.mubr.msk.f32.gmra.mrb[4].mxu0 %vm304_vm0, %v283_v20  ;;  %1272 = vmatpush3.bf16.msra.mxu1 %v1244_v26 }
  0x1c   : > { %1153 = vmatprep.mubr.msk.f32.mxu0 %vm304_vm0, %v284_v22  ;;  %1239 = vmatpush3.bf16.msra.mxu0 %v1236_v16 }
  0x1d   : > { %1241 = vmatprep.subr.bf16.mxu0 %v1240_v21  ;;  %1265 = vmatprep.subr.bf16.mxu1 %v1248_v31 }
  0x1f   : > { %1154 = vmatmul.mubr.msk.f32.gmra.mrb[6].mxu0 %vm304_vm0, %v285_v25  ;;  %1273 = vmatpush3.bf16.msra.mxu1 %v1248_v31 }
  0x20   : > { %1156 = vmatprep.mubr.msk.f32.mxu0 %vm304_vm0, %v286_v27  ;;  %1243 = vmatpush3.bf16.msra.mxu0 %v1240_v21 }
  0x21   : > { %1245 = vmatprep.subr.bf16.mxu0 %v1244_v26  ;;  %1266 = vmatprep.subr.bf16.mxu1 %v1252_v36 }
  0x23   : > { %1157 = vmatmul.mubr.msk.f32.gmra.mrb[8].mxu0 %vm304_vm0, %v287_v30  ;;  %1274 = vmatpush3.bf16.msra.mxu1 %v1252_v36 }
  0x24   : > { %1159 = vmatprep.mubr.msk.f32.mxu0 %vm304_vm0, %v288_v32  ;;  %1247 = vmatpush3.bf16.msra.mxu0 %v1244_v26 }
  0x25   : > { %1249 = vmatprep.subr.bf16.mxu0 %v1248_v31  ;;  %1267 = vmatprep.subr.bf16.mxu1 %v1256_v43 }
  0x27   : > { %1160 = vmatmul.mubr.msk.f32.gmra.mrb[10].mxu0 %vm304_vm0, %v289_v35  ;;  %1275 = vmatpush3.bf16.msra.mxu1 %v1256_v43 }
  0x28   : > { %1162 = vmatprep.mubr.msk.f32.mxu0 %vm304_vm0, %v290_v37  ;;  %1251 = vmatpush3.bf16.msra.mxu0 %v1248_v31 }
  0x29   : > { %1253 = vmatprep.subr.bf16.mxu0 %v1252_v36 }
  0x2b   : > { %1163 = vmatmul.mubr.msk.f32.gmra.mrb[12].mxu0 %vm304_vm0, %v291_v38 }
  0x2c   : > { %1165 = vmatprep.mubr.msk.f32.mxu0 %vm304_vm0, %v292_v39  ;;  %1255 = vmatpush3.bf16.msra.mxu0 %v1252_v36 }
  0x2d   : > { %1257 = vmatprep.subr.bf16.mxu0 %v1256_v43 }
  0x2f   : > { %1166 = vmatmul.mubr.msk.f32.gmra.mrb[14].mxu0 %vm304_vm0, %v293_v40 }
  0x30   : > { %1259 = vmatpush3.bf16.msra.mxu0 %v1256_v43 }
  0xe6   : > { %v1146_v45 = vpop.f32.mrb[0].mxu0 }
  0xe7   : > { %v425_v46 = vadd.f32 %v1146_v45, %v1050_v44  ;;  %v419_v47 = vpop.f32.mrb[1].mxu0 }
  0xe8   : > { %v420_v48 = vadd.f32 %v1050_v44, %v419_v47 }
  0xe9   : > { %v499_v51 = vmax.f32 %v425_v46, 0.0 }
  0xea   : > { %v498_v49 = vmax.f32 %v420_v48, 0.0  ;;  %v1149_v50 = vpop.f32.mrb[2].mxu0 }
  0xeb   : > { %v435_v52 = vadd.f32 %v1149_v50, %v1050_v44  ;;  %v429_v53 = vpop.f32.mrb[3].mxu0 }
  0xec   : > { %v430_v54 = vadd.f32 %v1050_v44, %v429_v53  ;;  %1200 = vmatprep.mubr.f32.mxu0 %v498_v49 }
  0xed   : > { %1201 = vmatmul.mubr.f32.vlgmr.msra.gmra.mrb[16].mxu0 %v499_v51  ;;  %v501_v57 = vmax.f32 %v435_v52, 0.0 }
  0xee   : > { %v500_v55 = vmax.f32 %v430_v54, 0.0  ;;  %v1152_v56 = vpop.f32.mrb[4].mxu0 }
  0xef   : > { %v445_v58 = vadd.f32 %v1152_v56, %v1050_v44  ;;  %v439_v59 = vpop.f32.mrb[5].mxu0 }
  0xf0   : > { %v440_v60 = vadd.f32 %v1050_v44, %v439_v59  ;;  %1203 = vmatprep.mubr.f32.mxu0 %v500_v55 }
  0xf1   : > { %v503_v61 = vmax.f32 %v445_v58, 0.0  ;;  %1204 = vmatmul.mubr.f32.gmra.mrb[18].mxu0 %v501_v57 }
  0xf2   : > { %v502_v62 = vmax.f32 %v440_v60, 0.0  ;;  %v1155_v63 = vpop.f32.mrb[6].mxu0 }
  0xf3   : > { %v455_v0 = vadd.f32 %v1155_v63, %v1050_v44  ;;  %v449_v1 = vpop.f32.mrb[7].mxu0 }
  0xf4   : > { %1206 = vmatprep.mubr.f32.mxu0 %v502_v62  ;;  %v450_v2 = vadd.f32 %v1050_v44, %v449_v1 }
  0xf5   : > { %v505_v3 = vmax.f32 %v455_v0, 0.0  ;;  %1207 = vmatmul.mubr.f32.gmra.mrb[20].mxu0 %v503_v61 }
  0xf6   : > { %v1158_v4 = vpop.f32.mrb[8].mxu0  ;;  %v504_v5 = vmax.f32 %v450_v2, 0.0 }
  0xf7   : > { %v465_v6 = vadd.f32 %v1158_v4, %v1050_v44  ;;  %v459_v7 = vpop.f32.mrb[9].mxu0 }
  0xf8   : > { %v460_v8 = vadd.f32 %v1050_v44, %v459_v7  ;;  %1209 = vmatprep.mubr.f32.mxu1 %v504_v5 }
  0xf9   : > { %v507_v9 = vmax.f32 %v465_v6, 0.0  ;;  %1210 = vmatmul.mubr.f32.vlgmr.msra.gmra.mrb[0].mxu1 %v505_v3 }
  0xfa   : > { %v506_v10 = vmax.f32 %v460_v8, 0.0  ;;  %v1161_v11 = vpop.f32.mrb[10].mxu0 }
  0xfb   : > { %v475_v12 = vadd.f32 %v1161_v11, %v1050_v44  ;;  %v469_v13 = vpop.f32.mrb[11].mxu0 }
  0xfc   : > { %v470_v14 = vadd.f32 %v1050_v44, %v469_v13  ;;  %1212 = vmatprep.mubr.f32.mxu1 %v506_v10 }
  0xfd   : > { %v509_v15 = vmax.f32 %v475_v12, 0.0  ;;  %1213 = vmatmul.mubr.f32.gmra.mrb[2].mxu1 %v507_v9 }
  0xfe   : > { %v508_v16 = vmax.f32 %v470_v14, 0.0  ;;  %v1164_v17 = vpop.f32.mrb[12].mxu0 }
  0xff   : > { %v485_v18 = vadd.f32 %v1164_v17, %v1050_v44  ;;  %v479_v19 = vpop.f32.mrb[13].mxu0 }
 0x100   : > { %v480_v20 = vadd.f32 %v1050_v44, %v479_v19  ;;  %1215 = vmatprep.mubr.f32.mxu1 %v508_v16 }
 0x101   : > { %v511_v21 = vmax.f32 %v485_v18, 0.0  ;;  %1216 = vmatmul.mubr.f32.gmra.mrb[4].mxu1 %v509_v15 }
 0x102   : > { %v510_v22 = vmax.f32 %v480_v20, 0.0  ;;  %v1167_v23 = vpop.f32.mrb[14].mxu0 }
 0x103   : > { %v495_v24 = vadd.f32 %v1167_v23, %v1050_v44  ;;  %v489_v25 = vpop.f32.mrb[15].mxu0 }
 0x104   : > { %v490_v26 = vadd.f32 %v1050_v44, %v489_v25  ;;  %1218 = vmatprep.mubr.f32.mxu1 %v510_v22 }
 0x105   : > { %v513_v27 = vmax.f32 %v495_v24, 0.0  ;;  %1219 = vmatmul.mubr.f32.gmra.mrb[6].mxu1 %v511_v21 }
 0x106   : > { %v512_v28 = vmax.f32 %v490_v26, 0.0 }
 0x108   : > { %1221 = vmatprep.mubr.f32.mxu1 %v512_v28 }
 0x109   : > { %1222 = vmatmul.mubr.f32.gmra.mrb[8].mxu1 %v513_v27 }
 0x1c0   : > { %v1202_v30 = vpop.f32.mrb[16].mxu0 }
 0x1c1   : > { %v609_v31 = vadd.f32 %v1202_v30, %v1510_v29  ;;  %v603_v32 = vpop.f32.mrb[17].mxu0 }
 0x1c2   : > { %v604_v33 = vadd.f32 %v1510_v29, %v603_v32  ;;  %v1549_v32 = vstv %s753_s9 }
 0x1c3   : > { %v683_v35 = vmax.f32 %v609_v31, 0.0 }
 0x1c4   : > { %v1205_v36 = vpop.f32.mrb[18].mxu0  ;;  %v682_v37 = vmax.f32 %v604_v33, 0.0 }
 0x1c5   : > { %v619_v38 = vadd.f32 %v1205_v36, %v1510_v29  ;;  %v613_v39 = vpop.f32.mrb[19].mxu0  ;;  %v706_v40 = vmul.f32 %v1517_v34, %v683_v35 }
 0x1c6   : > { %v614_v41 = vadd.f32 %v1510_v29, %v613_v39  ;;  %v705_v48 = vmul.f32 %v1517_v34, %v682_v37 }
 0x1c7   : > { %v685_v42 = vmax.f32 %v619_v38, 0.0  ;;  %723 = vadd.xlane.f32.xlu0 %v706_v40 }
 0x1c8   : > { %v1208_v43 = vpop.f32.mrb[20].mxu0  ;;  %v684_v44 = vmax.f32 %v614_v41, 0.0 }
 0x1c9   : > { %v629_v45 = vadd.f32 %v1208_v43, %v1510_v29  ;;  %v623_v46 = vpop.f32.mrb[21].mxu0  ;;  %v708_v47 = vmul.f32 %v1517_v34, %v685_v42 }
 0x1ca   : > { %v624_v49 = vadd.f32 %v1510_v29, %v623_v46  ;;  %v707_v55 = vmul.f32 %v1517_v34, %v684_v44 }
 0x1cb   : > { %727 = vadd.xlane.f32.xlu1 %v708_v47  ;;  %721 = vadd.xlane.f32.xlu0 %v705_v48  ;;  %v687_v52 = vmax.f32 %v629_v45, 0.0 }
 0x1cc   : > { %v686_v50 = vmax.f32 %v624_v49, 0.0  ;;  %v1211_v51 = vpop.f32.mrb[0].mxu1 }
 0x1cd   : > { %v639_v53 = vadd.f32 %v1211_v51, %v1510_v29  ;;  %v633_v54 = vpop.f32.mrb[1].mxu1  ;;  %v710_v63 = vmul.f32 %v1517_v34, %v687_v52 }
 0x1ce   : > { %v634_v56 = vadd.f32 %v1510_v29, %v633_v54  ;;  %v709_v57 = vmul.f32 %v1517_v34, %v686_v50 }
 0x1cf   : > { %725 = vadd.xlane.f32.xlu1 %v707_v55  ;;  %v689_v60 = vmax.f32 %v639_v53, 0.0 }
 0x1d0   : > { %v688_v58 = vmax.f32 %v634_v56, 0.0  ;;  %v1214_v59 = vpop.f32.mrb[2].mxu1  ;;  %729 = vadd.xlane.f32.xlu0 %v709_v57 }
 0x1d1   : > { %v649_v61 = vadd.f32 %v1214_v59, %v1510_v29  ;;  %v643_v62 = vpop.f32.mrb[3].mxu1  ;;  %v712_v7 = vmul.f32 %v1517_v34, %v689_v60  ;;  %v883_v60 = vlaneseq }
 0x1d2   : > { %v644_v0 = vadd.f32 %v1510_v29, %v643_v62  ;;  %v711_v1 = vmul.f32 %v1517_v34, %v688_v58 }
 0x1d3   : > { %731 = vadd.xlane.f32.xlu1 %v710_v63  ;;  %v691_v4 = vmax.f32 %v649_v61, 0.0 }
 0x1d4   : > { %v690_v2 = vmax.f32 %v644_v0, 0.0  ;;  %v1217_v3 = vpop.f32.mrb[4].mxu1  ;;  %733 = vadd.xlane.f32.xlu0 %v711_v1 }
 0x1d5   : > { %v659_v5 = vadd.f32 %v1217_v3, %v1510_v29  ;;  %v653_v6 = vpop.f32.mrb[5].mxu1  ;;  %v714_v15 = vmul.f32 %v1517_v34, %v691_v4 }
 0x1d6   : > { %v654_v8 = vadd.f32 %v1510_v29, %v653_v6  ;;  %v713_v9 = vmul.f32 %v1517_v34, %v690_v2 }
 0x1d7   : > { %735 = vadd.xlane.f32.xlu1 %v712_v7  ;;  %v693_v12 = vmax.f32 %v659_v5, 0.0  ;;  %v1562_v7 = vand.u32 127, %v883_v60 }
 0x1d8   : > { %v692_v10 = vmax.f32 %v654_v8, 0.0  ;;  %v1220_v11 = vpop.f32.mrb[6].mxu1  ;;  %737 = vadd.xlane.f32.xlu0 %v713_v9 }
 0x1d9   : > { %v669_v13 = vadd.f32 %v1220_v11, %v1510_v29  ;;  %v663_v14 = vpop.f32.mrb[7].mxu1  ;;  %v716_v23 = vmul.f32 %v1517_v34, %v693_v12 }
 0x1da   : > { %v664_v16 = vadd.f32 %v1510_v29, %v663_v14  ;;  %v715_v17 = vmul.f32 %v1517_v34, %v692_v10 }
 0x1db   : > { %739 = vadd.xlane.f32.xlu1 %v714_v15  ;;  %v695_v20 = vmax.f32 %v669_v13, 0.0 }
 0x1dc   : > { %v694_v18 = vmax.f32 %v664_v16, 0.0  ;;  %v1223_v19 = vpop.f32.mrb[8].mxu1  ;;  %741 = vadd.xlane.f32.xlu0 %v715_v17  ;;  %v1565_v16 = vshrl.u32 %v883_v60, 7 }
 0x1dd   : > { %v679_v21 = vadd.f32 %v1223_v19, %v1510_v29  ;;  %v673_v22 = vpop.f32.mrb[9].mxu1  ;;  %v718_v28 = vmul.f32 %v1517_v34, %v695_v20  ;;  %v889_v19 = vadd.s32 4294967288, %v1562_v7  ;;  %v903_v20 = vadd.s32 4294967272, %v1562_v7 }
 0x1de   : > { %v674_v24 = vadd.f32 %v1510_v29, %v673_v22  ;;  %v717_v25 = vmul.f32 %v1517_v34, %v694_v18 }
 0x1df   : > { %743 = vadd.xlane.f32.xlu1 %v716_v23  ;;  %v697_v27 = vmax.f32 %v679_v21, 0.0 }
 0x1e0   : > { %v696_v26 = vmax.f32 %v674_v24, 0.0  ;;  %745 = vadd.xlane.f32.xlu0 %v717_v25 }
 0x1e1   : > { %v720_v31 = vmul.f32 %v1517_v34, %v697_v27  ;;  %v896_v27 = vadd.s32 4294967280, %v1562_v7 }
 0x1e2   : > { %v719_v30 = vmul.f32 %v1517_v34, %v696_v26  ;;  %v887_v26 = vsub.s32 %v1562_v7, %v1565_v16 }
 0x1e3   : > { %747 = vadd.xlane.f32.xlu1 %v718_v28 }
 0x1e4   : > { %749 = vadd.xlane.f32.xlu0 %v719_v30 }
 0x1e7   : > { %751 = vadd.xlane.f32.xlu1 %v720_v31 }
 0x254   : > { %v724_v33 = vpop.xlane.xlu0 %723 }
 0x255   : > { %v756_v29 = vadd.f32 %v1549_v32, %v724_v33  ;;  %v910_v33 = vadd.s32 4294967264, %v1562_v7 }
 0x257   : > { %v1070_v35 = vmul.f32 -1.442695, %v756_v29 }
 0x258   : > { %v728_v36 = vpop.xlane.xlu1 %727  ;;  %v722_v37 = vpop.xlane.xlu0 %721 }
 0x259   : > { %1284 = vpow2.f32 %v1070_v35  ;;  %v758_v38 = vadd.f32 %v1549_v32, %v728_v36  ;;  %v755_v39 = vadd.f32 %v1549_v32, %v722_v37  ;;  %v892_v37 = vsub.s32 %v889_v19, %v1565_v16 }
 0x25b   : > { %v1072_v40 = vmul.f32 -1.442695, %v758_v38  ;;  %v1069_v41 = vmul.f32 -1.442695, %v755_v39  ;;  %v906_v38 = vsub.s32 %v903_v20, %v1565_v16 }
 0x25c   : > { %v726_v42 = vpop.xlane.xlu1 %725 }
 0x25d   : > { %1286 = vpow2.f32 %v1072_v40  ;;  %v757_v34 = vadd.f32 %v1549_v32, %v726_v42  ;;  %v730_v43 = vpop.xlane.xlu0 %729 }
 0x25e   : > { %1288 = vpow2.f32 %v1069_v41  ;;  %v759_v44 = vadd.f32 %v1549_v32, %v730_v43 }
 0x25f   : > { %v1071_v45 = vmul.f32 -1.442695, %v757_v34 }
 0x260   : > { %v1073_v46 = vmul.f32 -1.442695, %v759_v44  ;;  %v732_v47 = vpop.xlane.xlu1 %731  ;;  %v899_v44 = vsub.s32 %v896_v27, %v1565_v16  ;;  %v959_v27 = vadd.s32 4294967208, %v1562_v7 }
 0x261   : > { %1290 = vpow2.f32 %v1071_v45  ;;  %v760_v48 = vadd.f32 %v1549_v32, %v732_v47  ;;  %v734_v49 = vpop.xlane.xlu0 %733  ;;  %v917_v45 = vadd.s32 4294967256, %v1562_v7 }
 0x262   : > { %1292 = vpow2.f32 %v1073_v46  ;;  %v761_v50 = vadd.f32 %v1549_v32, %v734_v49  ;;  %v913_v49 = vsub.s32 %v910_v33, %v1565_v16 }
 0x263   : > { %v1285_v51 = vpop.eup %1284  ;;  %v1074_v52 = vmul.f32 -1.442695, %v760_v48 }
 0x264   : > { %v820_v53 = vadd.f32 1.0, %v1285_v51  ;;  %v1075_v54 = vmul.f32 -1.442695, %v761_v50  ;;  %v736_v55 = vpop.xlane.xlu1 %735 }
 0x265   : > { %1294 = vpow2.f32 %v1074_v52  ;;  %v762_v56 = vadd.f32 %v1549_v32, %v736_v55  ;;  %v738_v57 = vpop.xlane.xlu0 %737  ;;  %v924_v55 = vadd.s32 4294967248, %v1562_v7 }
 0x266   : > { %v763_v58 = vadd.f32 %v1549_v32, %v738_v57  ;;  %1296 = vpow2.f32 %v1075_v54 }
 0x267   : > { %v1287_v59 = vpop.eup %1286  ;;  %v1076_v61 = vmul.f32 -1.442695, %v762_v56  ;;  %1298 = vrcp.f32 %v820_v53 }
 0x268   : > { %v1289_v62 = vpop.eup %1288  ;;  %v822_v63 = vadd.f32 1.0, %v1287_v59  ;;  %v1077_v0 = vmul.f32 -1.442695, %v763_v58  ;;  %v740_v1 = vpop.xlane.xlu1 %739  ;;  %v931_v59 = vadd.s32 4294967240, %v1562_v7 }
 0x269   : > { %v819_v2 = vadd.f32 1.0, %v1289_v62  ;;  %1300 = vpow2.f32 %v1076_v61  ;;  %v764_v3 = vadd.f32 %v1549_v32, %v740_v1  ;;  %v742_v4 = vpop.xlane.xlu0 %741 }
 0x26a   : > { %1302 = vrcp.f32 %v822_v63  ;;  %v765_v5 = vadd.f32 %v1549_v32, %v742_v4 }
 0x26b   : > { %v1291_v6 = vpop.eup %1290  ;;  %1304 = vrcp.f32 %v819_v2  ;;  %v1078_v8 = vmul.f32 -1.442695, %v764_v3  ;;  %v938_v2 = vadd.s32 4294967232, %v1562_v7 }
 0x26c   : > { %v1293_v9 = vpop.eup %1292  ;;  %v821_v10 = vadd.f32 1.0, %v1291_v6  ;;  %1306 = vpow2.f32 %v1077_v0  ;;  %v1079_v11 = vmul.f32 -1.442695, %v765_v5  ;;  %v744_v12 = vpop.xlane.xlu1 %743  ;;  %v927_v6 = vsub.s32 %v924_v55, %v1565_v16 }
 0x26d   : > { %v823_v13 = vadd.f32 1.0, %v1293_v9  ;;  %1308 = vpow2.f32 %v1078_v8  ;;  %v766_v14 = vadd.f32 %v1549_v32, %v744_v12  ;;  %v746_v15 = vpop.xlane.xlu0 %745  ;;  %v945_v12 = vadd.s32 4294967224, %v1562_v7 }
 0x26e   : > { %1310 = vrcp.f32 %v821_v10  ;;  %v767_v17 = vadd.f32 %v1549_v32, %v746_v15 }
 0x26f   : > { %v1295_v18 = vpop.eup %1294  ;;  %1312 = vrcp.f32 %v823_v13  ;;  %v1080_v21 = vmul.f32 -1.442695, %v766_v14 }
 0x270   : > { %v824_v22 = vadd.f32 1.0, %v1295_v18  ;;  %1314 = vpow2.f32 %v1079_v11  ;;  %v1081_v23 = vmul.f32 -1.442695, %v767_v17  ;;  %v748_v24 = vpop.xlane.xlu1 %747  ;;  %v1297_v25 = vpop.eup %1296  ;;  %v934_v11 = vsub.s32 %v931_v59, %v1565_v16 }
 0x271   : > { %1316 = vpow2.f32 %v1080_v21  ;;  %v768_v28 = vadd.f32 %v1549_v32, %v748_v24  ;;  %v750_v30 = vpop.xlane.xlu0 %749  ;;  %v1299_v31 = vpop.eup %1298  ;;  %v825_v29 = vadd.f32 1.0, %v1297_v25  ;;  %v941_v18 = vsub.s32 %v938_v2, %v1565_v16 }
 0x272   : > { %1318 = vrcp.f32 %v824_v22  ;;  %v769_v35 = vadd.f32 %v1549_v32, %v750_v30  ;;  %v893_v54 = vrot.slane %v1299_v31, %v892_v37  ;;  %v952_v21 = vadd.s32 4294967216, %v1562_v7 }
 0x273   : > { %v1301_v36 = vpop.eup %1300  ;;  %1320 = vpow2.f32 %v1081_v23  ;;  %v1082_v39 = vmul.f32 -1.442695, %v768_v28  ;;  %v966_v31 = vadd.s32 4294967200, %v1562_v7 }
 0x274   : > { %v1303_v40 = vpop.eup %1302  ;;  %1322 = vrcp.f32 %v825_v29  ;;  %v826_v41 = vadd.f32 1.0, %v1301_v36  ;;  %v1083_v42 = vmul.f32 -1.442695, %v769_v35  ;;  %v752_v34 = vpop.xlane.xlu1 %751  ;;  %v955_v36 = vsub.s32 %v952_v21, %v1565_v16 }
 0x275   : > { %v1305_v43 = vpop.eup %1304  ;;  %1324 = vpow2.f32 %v1082_v39  ;;  %v770_v46 = vadd.f32 %v1549_v32, %v752_v34  ;;  %v920_v32 = vsub.s32 %v917_v45, %v1565_v16  ;;  %v907_v61 = vrot.slane %v1303_v40, %v906_v38 }
 0x276   : > { %v1307_v47 = vpop.eup %1306  ;;  %v888_v48 = vrot.slane %v1305_v43, %v887_v26  ;;  %1326 = vrcp.f32 %v826_v41  ;;  %v948_v26 = vsub.s32 %v945_v12, %v1565_v16  ;;  %v962_v40 = vsub.s32 %v959_v27, %v1565_v16 }
 0x277   : > { %v1309_v50 = vpop.eup %1308  ;;  %v827_v51 = vadd.f32 1.0, %v1307_v47  ;;  %1328 = vpow2.f32 %v1083_v42  ;;  %v1084_v52 = vmul.f32 -1.442695, %v770_v46  ;;  %v973_v41 = vadd.s32 4294967192, %v1562_v7 }
 0x278   : > { %v1311_v53 = vpop.eup %1310  ;;  %v828_v56 = vadd.f32 1.0, %v1309_v50  ;;  %v895_v62 = vsel %vm894_vm1, %v893_v54, %v888_v48  ;;  %v969_v43 = vsub.s32 %v966_v31, %v1565_v16  ;;  %v980_v47 = vadd.s32 4294967184, %v1562_v7 }
 0x279   : > { %v1313_v57 = vpop.eup %1312  ;;  %v900_v58 = vrot.slane %v1311_v53, %v899_v44  ;;  %1330 = vrcp.f32 %v827_v51  ;;  %v976_v50 = vsub.s32 %v973_v41, %v1565_v16 }
 0x27a   : > { %v1315_v60 = vpop.eup %1314  ;;  %v914_v63 = vrot.slane %v1313_v57, %v913_v49  ;;  %1332 = vrcp.f32 %v828_v56  ;;  %v983_v56 = vsub.s32 %v980_v47, %v1565_v16 }
 0x27b   : > { %v1317_v0 = vpop.eup %1316  ;;  %v902_v1 = vsel %vm901_vm2, %v900_v58, %v895_v62  ;;  %v829_v3 = vadd.f32 1.0, %v1315_v60  ;;  %1334 = vpow2.f32 %v1084_v52  ;;  %v987_v52 = vadd.s32 4294967176, %v1562_v7 }
 0x27c   : > { %v1319_v4 = vpop.eup %1318  ;;  %v909_v5 = vsel %vm908_vm3, %v907_v61, %v902_v1  ;;  %v830_v8 = vadd.f32 1.0, %v1317_v0 }
 0x27d   : > { %v1321_v9 = vpop.eup %1320  ;;  %v921_v10 = vrot.slane %v1319_v4, %v920_v32  ;;  %1336 = vrcp.f32 %v829_v3  ;;  %v916_v14 = vsel %vm915_vm4, %v914_v63, %v909_v5  ;;  %v990_v59 = vsub.s32 %v987_v52, %v1565_v16 }
 0x27e   : > { %v1323_v13 = vpop.eup %1322  ;;  %1338 = vrcp.f32 %v830_v8  ;;  %v831_v15 = vadd.f32 1.0, %v1321_v9 }
 0x27f   : > { %v1325_v17 = vpop.eup %1324  ;;  %v928_v20 = vrot.slane %v1323_v13, %v927_v6  ;;  %v923_v24 = vsel %vm922_vm5, %v921_v10, %v916_v14 }
 0x280   : > { %v1327_v19 = vpop.eup %1326  ;;  %1340 = vrcp.f32 %v831_v15  ;;  %v832_v22 = vadd.f32 1.0, %v1325_v17 }
 0x281   : > { %v1329_v23 = vpop.eup %1328  ;;  %v935_v25 = vrot.slane %v1327_v19, %v934_v11  ;;  %v930_v29 = vsel %vm929_vm6, %v928_v20, %v923_v24 }
 0x282   : > { %1342 = vrcp.f32 %v832_v22  ;;  %v833_v28 = vadd.f32 1.0, %v1329_v23 }
 0x283   : > { %v1331_v30 = vpop.eup %1330  ;;  %v937_v38 = vsel %vm936_vm7, %v935_v25, %v930_v29 }
 0x284   : > { %v1333_v33 = vpop.eup %1332  ;;  %v942_v35 = vrot.slane %v1331_v30, %v941_v18  ;;  %1344 = vrcp.f32 %v833_v28 }
 0x285   : > { %v1335_v37 = vpop.eup %1334  ;;  %v949_v39 = vrot.slane %v1333_v33, %v948_v26 }
 0x286   : > { %v834_v42 = vadd.f32 1.0, %v1335_v37  ;;  %v944_v45 = vsel %vm943_vm8, %v942_v35, %v937_v38 }
 0x287   : > { %v1337_v34 = vpop.eup %1336  ;;  %v951_v48 = vsel %vm950_vm9, %v949_v39, %v944_v45 }
 0x288   : > { %v1339_v44 = vpop.eup %1338  ;;  %v956_v46 = vrot.slane %v1337_v34, %v955_v36  ;;  %1346 = vrcp.f32 %v834_v42 }
 0x289   : > { %v963_v49 = vrot.slane %v1339_v44, %v962_v40 }
 0x28a   : > { %v1341_v51 = vpop.eup %1340  ;;  %v958_v54 = vsel %vm957_vm10, %v956_v46, %v951_v48 }
 0x28b   : > { %v970_v55 = vrot.slane %v1341_v51, %v969_v43  ;;  %v965_v57 = vsel %vm964_vm11, %v963_v49, %v958_v54 }
 0x28c   : > { %v1343_v53 = vpop.eup %1342 }
 0x28d   : > { %v977_v58 = vrot.slane %v1343_v53, %v976_v50  ;;  %v972_v60 = vsel %vm971_vm12, %v970_v55, %v965_v57 }
 0x28e   : > { %v1345_v32 = vpop.eup %1344 }
 0x28f   : > { %v984_v61 = vrot.slane %v1345_v32, %v983_v56  ;;  %v979_v62 = vsel %vm978_vm13, %v977_v58, %v972_v60 }
 0x291   : > { %v986_v0 = vsel %vm985_vm14, %v984_v61, %v979_v62 }
 0x292   : > { %v1347_v63 = vpop.eup %1346 }
 0x293   : > { %v991_v7 = vrot.slane %v1347_v63, %v990_v59 }
 0x295   : > { %v993_v1 = vsel %vm992_vm15, %v991_v7, %v986_v0 }
 0x296   : > { %995 = vst [vmem:[%s277_s12] sm:$0x1] %v993_v1 }
 0x297 PF: > { %s18_s26 = sadd.s32 1, %s1354_s26  }
 0x298   : > { %p15_p5 = scmp.ge.s32.totalorder %s18_s26, 5  }
 0x29a   :  { %17 = sbr.rel (!%p15_p5) target bundleno = 2 (0x2), region = 78 }

</bundles_post_ra>
